<compile_context>
chip_gen: v7x
topology: tpu7x:2x2x1
jax: 0.10.0
libtpu: 0.0.40
codegen_flags: <defaults>
</compile_context>

<pallas_src>
import numpy as np
import jax
import jax.numpy as jnp
from jax.experimental import pallas as pl
from jax.experimental.pallas import tpu as pltpu


_LANE = 128
_TARGET_TILE_BYTES = 4 * 1024 * 1024     # per input tile (Pallas double-buffers it)
_VMEM_LIMIT_BYTES = 32 * 1024 * 1024     # safe on v5e/v6e (128 MiB) and v7x (64 MiB)


def _min_identity(dtype):
    dtype = jnp.dtype(dtype)
    if jnp.issubdtype(dtype, jnp.floating):
        return jnp.array(jnp.inf, dtype)
    if jnp.issubdtype(dtype, jnp.integer):
        return jnp.array(jnp.iinfo(dtype).max, dtype)
    raise ValueError(f"unsupported dtype {dtype}")


def _sublane_multiple(itemsize):
    # packed-sublane layout: 8 rows for 4-byte, 16 for bf16/f16, 32 for int8/fp8
    if itemsize >= 4:
        return 8
    if itemsize == 2:
        return 16
    return 32


def _round_down(x, m):
    return (x // m) * m


def _round_up(x, m):
    return ((x + m - 1) // m) * m


def _make_amin_kernel(R, TR, ident):
    rem = R % TR

    def kernel(x_ref, o_ref):
        r = pl.program_id(1)
        x = x_ref[...]
        if rem != 0:
            # Last reduced-axis tile is ragged: fill out-of-range lanes with
            # the min identity (cheap VPU compare+select).
            lane = jax.lax.broadcasted_iota(jnp.int32, x.shape, 1)
            x = jnp.where(lane + r * TR < R, x, ident)
        part = jnp.min(x, axis=-1, keepdims=True)

        # Output block is resident across the r axis (index_map ignores r),
        # so it acts as the accumulator.  NOTE: correctness of any overlapping
        # / partial output tiles relies on min-writes being idempotent.
        @pl.when(r == 0)
        def _init():
            o_ref[...] = part

        @pl.when(r != 0)
        def _acc():
            o_ref[...] = jnp.minimum(o_ref[...], part)

    return kernel


def _amin_2d(x2, K, R):
    """Row-wise min of a (K, R) array -> (K,)."""
    dtype = x2.dtype
    itemsize = jnp.dtype(dtype).itemsize
    sm = _sublane_multiple(itemsize)
    ident = _min_identity(dtype)

    # ---- tile selection (large, dtype-aware tiles; ~4 MiB per input buffer) ----
    if R * itemsize * sm <= _TARGET_TILE_BYTES:
        # Full reduced extent fits in one lane tile.
        TR = R
        rows = max(sm, _round_down(_TARGET_TILE_BYTES // max(R * itemsize, 1), sm))
        TK = K if K <= rows else rows           # K == full dim is always legal
    else:
        # Tile the reduced axis; keep per-tile bytes bounded for VMEM.
        TK = K if K < 256 else 256              # 256 is a multiple of 8/16/32
        TR = _round_down(_TARGET_TILE_BYTES // max(TK * itemsize, 1), _LANE)
        TR = max(_LANE, min(TR, _round_up(R, _LANE)))

    nK = pl.cdiv(K, TK)
    nR = pl.cdiv(R, TR)

    kernel = _make_amin_kernel(R, TR, ident)

    out = pl.pallas_call(
        kernel,
        out_shape=jax.ShapeDtypeStruct((K, 1), dtype),
        grid=(nK, nR),
        in_specs=[pl.BlockSpec((TK, TR), lambda i, r: (i, r))],
        out_specs=pl.BlockSpec((TK, 1), lambda i, r: (i, 0)),
        compiler_params=pltpu.CompilerParams(
            dimension_semantics=("parallel", "arbitrary"),
            vmem_limit_bytes=_VMEM_LIMIT_BYTES,
        ),
        cost_estimate=pl.CostEstimate(
            flops=K * R,
            transcendentals=0,
            bytes_accessed=K * R * itemsize + K * itemsize,
        ),
    )(x2)
    return out[:, 0]


def amin_pallas(x, dim=None, keepdim=False):
    """torch.amin(x, dim=dim, keepdim=keepdim) semantics."""
    orig_shape = x.shape
    ndim = x.ndim

    if dim is None:
        red_axes = tuple(range(ndim))
    else:
        if isinstance(dim, int):
            dim = (dim,)
        red_axes = tuple(sorted(d % ndim for d in dim))

    if len(red_axes) == 0:
        return x

    kept_axes = tuple(a for a in range(ndim) if a not in red_axes)
    kept_shape = tuple(orig_shape[a] for a in kept_axes)

    K = int(np.prod([orig_shape[a] for a in kept_axes], dtype=np.int64)) if kept_axes else 1
    R = int(np.prod([orig_shape[a] for a in red_axes], dtype=np.int64))

    if R == 0:
        raise ValueError("amin over a zero-sized dimension is not defined")

    # Bool inputs: compute on uint8 (min == logical AND), cast back.
    is_bool = x.dtype == jnp.bool_
    xin = x.astype(jnp.uint8) if is_bool else x

    if K == 0:
        res = jnp.zeros(kept_shape, x.dtype)
    else:
        # Fast path: reduced axes already trailing -> reshape is a view, no
        # transpose materialization in HBM.
        if red_axes == tuple(range(ndim - len(red_axes), ndim)):
            xt = xin
        else:
            # TODO(synk): middle-axis reductions still materialize a transpose;
            # could be avoided with a 3-D (kept_outer, reduced, kept_inner) BlockSpec.
            xt = jnp.transpose(xin, kept_axes + red_axes)
        x2 = xt.reshape(K, R)
        res = _amin_2d(x2, K, R)
        if is_bool:
            res = res.astype(jnp.bool_)
        res = res.reshape(kept_shape)

    if keepdim:
        for a in red_axes:  # sorted -> insertion order is correct
            res = jnp.expand_dims(res, a)
    return res


class AminModel:
    """Mirror of the PyTorch AminModel (no parameters)."""

    def __init__(self, dim=None, keepdim=False):
        self.dim = dim
        self.keepdim = keepdim

    def __call__(self, x):
        return amin_pallas(x, dim=self.dim, keepdim=self.keepdim)


if __name__ == "__main__":
    key = jax.random.PRNGKey(0)
    x = jax.random.normal(key, (2, 4, 16, 16), dtype=jnp.float32)

    configs = [
        (None, False),
        (None, True),
        (1, False),
        (1, True),
        (-1, False),
        ((2, 3), False),
        ((2, 3), True),
        ((0, 1), True),
    ]

    for dim, keepdim in configs:
        model = AminModel(dim=dim, keepdim=keepdim)
        out = jax.block_until_ready(model(x))
        if dim is None:
            ref = jnp.min(x)
            if keepdim:
                ref = ref.reshape((1,) * x.ndim)
        else:
            ref = jnp.min(x, axis=dim, keepdims=keepdim)
        assert out.shape == ref.shape, (dim, keepdim, out.shape, ref.shape)
        assert out.dtype == ref.dtype
        np.testing.assert_allclose(np.asarray(out), np.asarray(ref), rtol=0, atol=0)

    print("KERNEL_OK")
</pallas_src>

<mosaic_0001>
module attributes {stable_mosaic.version = 11 : i64} {
  func.func @kernel(%arg0: i32, %arg1: i32, %arg2: memref<1x2048xf32, #tpu.memory_space<vmem>>, %arg3: memref<1x1xf32, #tpu.memory_space<vmem>>) attributes {dimension_semantics = [#tpu.dimension_semantics<parallel>, #tpu.dimension_semantics<arbitrary>], iteration_bounds = array<i64: 1, 1>, scalar_prefetch = 0 : i64, scratch_operands = 0 : i64, tpu.core_type = #tpu.core_type<tc>, window_params = [{transform_indices = @transform_0, window_bounds = array<i64: 1, 2048>}, {transform_indices = @transform_1, window_bounds = array<i64: 1, 1>}]} {
    %c0 = arith.constant 0 : index
    %c0_0 = arith.constant 0 : index
    %0 = vector.load %arg2[%c0, %c0_0] : memref<1x2048xf32, #tpu.memory_space<vmem>>, vector<1x2048xf32>
    %cst = arith.constant dense<0x7F800000> : vector<1xf32>
    %1 = vector.multi_reduction <minimumf>, %0, %cst [1] : vector<1x2048xf32> to vector<1xf32>
    %2 = vector.shape_cast %1 : vector<1xf32> to vector<1x1xf32>
    %c0_i32 = arith.constant 0 : i32
    %3 = arith.cmpi eq, %arg1, %c0_i32 : i32
    %4 = arith.extui %3 : i1 to i32
    %c0_i32_1 = arith.constant 0 : i32
    %5 = arith.cmpi ne, %4, %c0_i32_1 : i32
    scf.if %5 {
      %c0_4 = arith.constant 0 : index
      %c0_5 = arith.constant 0 : index
      %9 = vector.load %arg3[%c0_4, %c0_5] : memref<1x1xf32, #tpu.memory_space<vmem>>, vector<1x1xf32>
      tpu.vector_store %arg3[%c0_4, %c0_5], %2 {strides = array<i32>} : memref<1x1xf32, #tpu.memory_space<vmem>>, vector<1x1xf32>,
    } else {
    }
    %c0_i32_2 = arith.constant 0 : i32
    %6 = arith.cmpi ne, %arg1, %c0_i32_2 : i32
    %7 = arith.extui %6 : i1 to i32
    %c0_i32_3 = arith.constant 0 : i32
    %8 = arith.cmpi ne, %7, %c0_i32_3 : i32
    scf.if %8 {
      %c0_4 = arith.constant 0 : index
      %c0_5 = arith.constant 0 : index
      %9 = vector.load %arg3[%c0_4, %c0_5] : memref<1x1xf32, #tpu.memory_space<vmem>>, vector<1x1xf32>
      %10 = arith.minimumf %9, %2 : vector<1x1xf32>
      %c0_6 = arith.constant 0 : index
      %c0_7 = arith.constant 0 : index
      %11 = vector.load %arg3[%c0_6, %c0_7] : memref<1x1xf32, #tpu.memory_space<vmem>>, vector<1x1xf32>
      tpu.vector_store %arg3[%c0_6, %c0_7], %10 {strides = array<i32>} : memref<1x1xf32, #tpu.memory_space<vmem>>, vector<1x1xf32>,
    } else {
    }
    return
  }
  func.func @transform_0(%arg0: i32, %arg1: i32) -> (i32, i32) {
    %c0_i32 = arith.constant 0 : i32
    return %arg0, %arg1 : i32, i32
  }
  func.func @transform_1(%arg0: i32, %arg1: i32) -> (i32, i32) {
    %c0_i32 = arith.constant 0 : i32
    %c0_i32_0 = arith.constant 0 : i32
    return %arg0, %c0_i32 : i32, i32
  }
}

</mosaic_0001>

<bundles_post_ra>
// kernel: tpu_custom_call.1
= control target key start
LH: loop header
LB: loop body
LE: loop exit
PB: predicated region body
PF: predicated region fallthrough
CT: control target
= control target key end

     0   :  { %6 = vsyncpa [#allocation3], 0  ;;  %s270_s0 = inlined_call_operand.hbm [shape: f32[1,2048], index: 0, kind: input, shape index: {}]   ;;  %s271_s1 = inlined_call_operand.hbm [shape: f32[1,1], index: 1, kind: output, shape index: {}]  }
   0x1   :  { %7 = vsyncpa [#allocation4], 0  ;;  %s218_s6 = smov [#allocation2]   ;;  %s170_s10 = scalar_lea.hbm %s270_s0, 256 }
   0x2   :  { %s14_s7 = sshll.u32 %s218_s6, 4  ;;  %p171_p0 = scmp.ne.s32.totalorder %s270_s0, %s170_s10  ;;  %s15_s7 = int_to_ptr.vmem [resolvable:$true] %s14_s7 }
   0x3   :  { %p174_p1 = scmp.lt.u32.totalorder %s170_s10, %s270_s0 }
   0x5   :  { %p176_p2 = pnand %p174_p1, %p171_p0 }
   0x7   :  { %179 = shalt.err (!%p176_p2)
}
   0x8   :  { %s180_s15 = scalar_lea.vmem %s15_s7, 256  ;;  %p185_p4 = scmp.lt.s32.totalorder %s15_s7, %s15_s7 }
   0x9   :  { %p181_p3 = scmp.ne.s32.totalorder %s15_s7, %s180_s15  ;;  %p186_p5 = scmp.lt.s32.totalorder %s180_s15, %s180_s15 }
   0xb   :  { %p187_p6 = por %p186_p5, %p185_p4 }
   0xd   :  { %p188_p7 = pnand %p187_p6, %p181_p3 }
   0xf   :  { %191 = shalt.err (!%p188_p7)
}
  0x10   :  { %17 = dma.hbm_to_vmem [thread:$0]  %s270_s0, 256, %s15_s7, [#allocation3]  }
  0x11   :  { %214 = dma.done.wait [#allocation3], 256  }
  0x12   :  { %215 = vsyncadd [#allocation3], 4294967040  ;;  %v25_v0 = vlaneseq  ;;  %v21_v10 = vld [vmem:[#allocation2] sm:$0xff]  ;;  %v22_v11 = vld [vmem:[#allocation2 + $0x8] sm:$0xff]  ;;  %vm105_vm0 = vcmask 1040384   ;;  %s219_s0 = smov [#allocation5]  }
  0x13   :  { %s159_s18 = sshll.u32 %s219_s0, 4  ;;  %vm143_vm1 = vcmask 0   ;;  %s160_s18 = int_to_ptr.vmem [resolvable:$true] %s159_s18 }
  0x14   :  { %v26_v1 = vshrl.u32 %v25_v0, 7  ;;  %s192_s19 = scalar_lea.vmem %s160_s18, 16  ;;  %s196_s20 = scalar_lea.vmem %s160_s18, 32 }
  0x15   :  { %p193_p8 = scmp.ne.s32.totalorder %s160_s18, %s192_s19  ;;  %p197_p9 = scmp.lt.s32.totalorder %s160_s18, %s160_s18 }
  0x16   :  { %v27_v2 = vsub.s32 0, %v26_v1  ;;  %v31_v3 = vsub.s32 1, %v26_v1  ;;  %v35_v4 = vsub.s32 2, %v26_v1  ;;  %v39_v5 = vsub.s32 3, %v26_v1  ;;  %p198_p10 = scmp.lt.s32.totalorder %s196_s20, %s192_s19 }
  0x17   :  { %v43_v6 = vsub.s32 4, %v26_v1  ;;  %v47_v7 = vsub.s32 5, %v26_v1  ;;  %v51_v8 = vsub.s32 6, %v26_v1  ;;  %v55_v9 = vsub.s32 7, %v26_v1 }
  0x18   :  { %v28_v12 = vrot.slane %v21_v10, %v27_v2  ;;  %v32_v13 = vrot.slane %v21_v10, %v31_v3  ;;  %v36_v14 = vrot.slane %v21_v10, %v35_v4  ;;  %v40_v15 = vrot.slane %v21_v10, %v39_v5  ;;  %p199_p11 = por %p198_p10, %p197_p9 }
  0x19   :  { %v44_v16 = vrot.slane %v21_v10, %v43_v6  ;;  %v48_v17 = vrot.slane %v21_v10, %v47_v7  ;;  %v52_v18 = vrot.slane %v21_v10, %v51_v8  ;;  %v56_v19 = vrot.slane %v21_v10, %v55_v9 }
  0x1a   :  { %v60_v20 = vrot.slane %v22_v11, %v27_v2  ;;  %v64_v21 = vrot.slane %v22_v11, %v31_v3  ;;  %v68_v22 = vrot.slane %v22_v11, %v35_v4  ;;  %v72_v23 = vrot.slane %v22_v11, %v39_v5  ;;  %p200_p12 = pnand %p199_p11, %p193_p8 }
  0x1b   :  { %v76_v24 = vrot.slane %v22_v11, %v43_v6  ;;  %v80_v25 = vrot.slane %v22_v11, %v47_v7  ;;  %v84_v26 = vrot.slane %v22_v11, %v51_v8  ;;  %v88_v27 = vrot.slane %v22_v11, %v55_v9 }
  0x1c   :  { %v106_v28 = vsel %vm105_vm0, %v28_v12, inf  ;;  %v107_v29 = vsel %vm105_vm0, %v32_v13, inf  ;;  %v108_v30 = vsel %vm105_vm0, %v36_v14, inf  ;;  %v109_v31 = vsel %vm105_vm0, %v40_v15, inf }
  0x1d   :  { %v110_v32 = vsel %vm105_vm0, %v44_v16, inf  ;;  %v112_v33 = vsel %vm105_vm0, %v48_v17, inf  ;;  %v114_v34 = vsel %vm105_vm0, %v52_v18, inf  ;;  %v116_v35 = vsel %vm105_vm0, %v56_v19, inf }
  0x1e   :  { %v111_v36 = vmin.f32 %v106_v28, %v110_v32  ;;  %v113_v37 = vmin.f32 %v107_v29, %v112_v33  ;;  %v115_v38 = vmin.f32 %v108_v30, %v114_v34  ;;  %v117_v39 = vmin.f32 %v109_v31, %v116_v35 }
  0x1f   :  { %v118_v40 = vsel %vm105_vm0, %v60_v20, inf  ;;  %v120_v41 = vsel %vm105_vm0, %v64_v21, inf  ;;  %v122_v42 = vsel %vm105_vm0, %v68_v22, inf  ;;  %v124_v43 = vsel %vm105_vm0, %v72_v23, inf }
  0x20   :  { %v119_v44 = vmin.f32 %v111_v36, %v118_v40  ;;  %v121_v45 = vmin.f32 %v113_v37, %v120_v41  ;;  %v123_v46 = vmin.f32 %v115_v38, %v122_v42  ;;  %v125_v47 = vmin.f32 %v117_v39, %v124_v43 }
  0x21   :  { %v126_v48 = vsel %vm105_vm0, %v76_v24, inf  ;;  %v128_v49 = vsel %vm105_vm0, %v80_v25, inf  ;;  %v130_v50 = vsel %vm105_vm0, %v84_v26, inf  ;;  %v132_v51 = vsel %vm105_vm0, %v88_v27, inf }
  0x22   :  { %v127_v52 = vmin.f32 %v119_v44, %v126_v48  ;;  %v129_v53 = vmin.f32 %v121_v45, %v128_v49  ;;  %v131_v54 = vmin.f32 %v123_v46, %v130_v50  ;;  %v133_v55 = vmin.f32 %v125_v47, %v132_v51 }
  0x24   :  { %v134_v56 = vmin.f32 %v127_v52, %v129_v53  ;;  %v135_v57 = vmin.f32 %v131_v54, %v133_v55 }
  0x26   :  { %v136_v58 = vmin.f32 %v134_v56, %v135_v57 }
  0x28   :  { %137 = vmin.xlane.f32.xlu0 %v136_v58 }
  0xb5   :  { %v138_v59 = vpop.xlane.xlu0 %137 }
  0xb6   :  { %144 = vst.msk [vmem:[#allocation5] sm:$0x1] %vm143_vm1, %v138_v59 }
  0xb7   :  { %203 = shalt.err (!%p200_p12)
}
  0xb8   :  { %s204_s23 = scalar_lea.hbm %s271_s1, 16 }
  0xb9   :  { %p205_p13 = scmp.ne.s32.totalorder %s271_s1, %s204_s23  ;;  %p208_p0 = scmp.lt.u32.totalorder %s204_s23, %s271_s1 }
  0xbb   :  { %p210_p1 = pnand %p208_p0, %p205_p13 }
  0xbd   :  { %213 = shalt.err (!%p210_p1)
}
  0xbe   :  { %162 = dma.vmem_to_hbm [thread:$0]  %s160_s18, 16, %s271_s1, [#allocation4]  }
  0xbf   :  { %216 = dma.done.wait [#allocation4], 16  }
  0xc0   :  { %217 = vsyncadd [#allocation4], 4294967280 }
  0xc1   :  { %166 = vsyncpa [#allocation3], 1 }
  0xc2   :  { %167 = vsyncpa [#allocation4], 1 }

</bundles_post_ra>
